<compile_context>
chip_gen: v6e
topology: v6e:2x2x1
jax: 0.10.0
libtpu: 0.0.40
codegen_flags: <defaults>
</compile_context>

<pallas_src>
import functools

import jax
import jax.numpy as jnp
from jax.experimental import pallas as pl
from jax.experimental.pallas import tpu as pltpu


def _round_up(x, m):
    return ((x + m - 1) // m) * m


def _vmem_capacity_bytes():
    """Physical VMEM per core, with a conservative (v7x-safe) 64 MiB fallback."""
    try:
        info = pltpu.get_tpu_info()
        cap = int(getattr(info, "vmem_capacity_bytes", 0) or 0)
        if cap > 0:
            return cap
    except Exception:
        pass
    return 64 * 1024 * 1024


def _choose_tk(in_features, max_tk):
    """Largest K chunk that is either the full in_features or a 128-multiple divisor."""
    if in_features <= max_tk:
        return in_features
    t = (max_tk // 128) * 128
    while t >= 128:
        if in_features % t == 0:
            return t
        t -= 128
    # TODO(synk): no lane-aligned divisor of in_features fits the budget; fall back to
    # a fully resident W1^T (may exceed the VMEM budget for pathological in_features).
    return in_features


# --------------------------------------------------------------------------------------
# Kernels
# --------------------------------------------------------------------------------------
def _lora_kernel_resident(*refs, has_bias):
    """Resident-W2^T mode.

    Grid = (M tiles, K tiles).  The sequential ("arbitrary") K axis accumulates the
    low-rank hidden h = x @ W1^T into an f32 VMEM scratch; at the last K step the
    second matmul + (optional) bias + store run against the fully VMEM-resident W2^T.
    """
    if has_bias:
        x_ref, w1_ref, w2_ref, b_ref, o_ref, h_ref = refs
    else:
        x_ref, w1_ref, w2_ref, o_ref, h_ref = refs
        b_ref = None

    k = pl.program_id(1)
    nk = pl.num_programs(1)

    part = jnp.dot(x_ref[...], w1_ref[...], preferred_element_type=jnp.float32)

    @pl.when(k == 0)
    def _():
        h_ref[...] = part

    @pl.when(k > 0)
    def _():
        h_ref[...] = h_ref[...] + part

    @pl.when(k == nk - 1)
    def _():
        # Single downcast per M tile so the second dot is MXU-native; f32 accumulation.
        h = h_ref[...].astype(w2_ref.dtype)
        y = jnp.dot(h, w2_ref[...], preferred_element_type=jnp.float32)
        if has_bias:
            y = y + b_ref[...].astype(jnp.float32)
        o_ref[...] = y.astype(o_ref.dtype)


def _lora_kernel_tiled_n(*refs, has_bias):
    """Tiled-N fallback (very large out_features).  Grid = (M tiles, N tiles).

    NOTE: the hidden-scratch reuse relies on the N axis being the innermost,
    sequentially-executed ("arbitrary") axis so every M tile sees j == 0 first.
    Do not mark the N axis parallel or reorder the grid.
    """
    if has_bias:
        x_ref, w1_ref, w2_ref, b_ref, o_ref, h_ref = refs
    else:
        x_ref, w1_ref, w2_ref, o_ref, h_ref = refs
        b_ref = None

    j = pl.program_id(1)

    @pl.when(j == 0)
    def _():
        # Hidden cached directly in the compute dtype: no per-N-tile f32->bf16 recast
        # and half the scratch VMEM vs an f32 scratch.
        h_ref[...] = jnp.dot(
            x_ref[...], w1_ref[...], preferred_element_type=jnp.float32
        ).astype(h_ref.dtype)

    y = jnp.dot(h_ref[...], w2_ref[...], preferred_element_type=jnp.float32)
    if has_bias:
        y = y + b_ref[...].astype(jnp.float32)
    o_ref[...] = y.astype(o_ref.dtype)


# --------------------------------------------------------------------------------------
# Wrappers
# --------------------------------------------------------------------------------------
def prepare_lora_lin_weights(w1, w2, b=None, compute_dtype=None):
    """One-time weight prep: transpose to (in, rank) / (rank, out), pad out_features to
    a lane multiple (128) and cast to the compute dtype.  Do this once at init and
    reuse with lora_lin_apply() to avoid per-call weight copies."""
    rank, in_features = w1.shape
    out_features, rank2 = w2.shape
    assert rank2 == rank
    cdt = compute_dtype if compute_dtype is not None else w1.dtype
    out_p = _round_up(out_features, 128)

    w1t = jnp.asarray(w1, cdt).T                      # (in_features, rank)
    w2t = jnp.asarray(w2, cdt).T                      # (rank, out_features)
    if out_p != out_features:
        w2t = jnp.pad(w2t, ((0, 0), (0, out_p - out_features)))
    b2d = None
    if b is not None:
        b2d = jnp.asarray(b).reshape(1, out_features)
        if out_p != out_features:
            b2d = jnp.pad(b2d, ((0, 0), (0, out_p - out_features)))
    return w1t, w2t, b2d, out_features


@functools.partial(
    jax.jit,
    static_argnames=("out_features", "tile_m", "tile_n", "out_dtype",
                     "force_tiled_n", "max_tk"))
def lora_lin_apply(x, w1t, w2t, b2d=None, *, out_features, tile_m=256, tile_n=512,
                   out_dtype=None, force_tiled_n=False, max_tk=None):
    """Fused y = (x @ W1^T) @ W2^T + b with prepared weights.

    w1t: (in_features, rank), w2t: (rank, out_p) with out_p a multiple of 128,
    b2d: (1, out_p) or None.  Matmul operands use w1t/w2t's dtype (e.g. bf16 for
    MXU-native throughput); accumulation is always f32; the output dtype defaults to
    x.dtype.  `force_tiled_n` / `max_tk` are test knobs to exercise both modes.
    """
    in_features, rank = w1t.shape
    rank2, out_p = w2t.shape
    assert rank2 == rank and out_p % 128 == 0
    assert x.shape[-1] == in_features
    assert out_features <= out_p

    lead_shape = x.shape[:-1]
    odt = jnp.dtype(out_dtype) if out_dtype is not None else x.dtype
    cdt = w1t.dtype

    x2d = x.reshape(-1, in_features).astype(cdt)
    m = x2d.shape[0]
    has_bias = b2d is not None

    cb = jnp.dtype(cdt).itemsize
    ob = jnp.dtype(odt).itemsize
    bb = jnp.dtype(b2d.dtype).itemsize if has_bias else 0
    sub = max(8, 32 // cb)            # sublane packing: 8 f32 / 16 bf16 / 32 int8

    cap = _vmem_capacity_bytes()
    usable = (cap * 3) // 4           # headroom for Pallas-internal scratch

    # ---- M tiling (parallel axis) ----------------------------------------------------
    tm = min(_round_up(tile_m, sub), _round_up(m, sub))
    # Megacore: give each v7x TensorCore at least one M block when there is work.
    if _round_up(m, tm) // tm < 2 and m > sub:
        tm_half = _round_up(-(-m // 2), sub)
        if tm_half < tm:
            tm = tm_half

    # ---- mode selection from the real VMEM footprint ---------------------------------
    const_resident = (2 * rank * out_p * cb      # W2^T (constant block)
                      + 2 * out_p * bb           # bias (constant block)
                      + 2 * tm * out_p * ob      # output tile (double-buffered)
                      + tm * rank * 4)           # f32 hidden scratch
    use_resident = (not force_tiled_n) and const_resident <= usable

    if use_resident:
        per_k = 2 * cb * (tm + rank)             # x tile + W1^T K-chunk (double-buffered)
        tk_budget = max((usable - const_resident) // per_k, 0)
        if max_tk is not None:
            tk_budget = min(tk_budget, max_tk)
        tk = _choose_tk(in_features, tk_budget)
        grid_k = in_features // tk
        tn = out_p
        footprint = const_resident + per_k * tk
    else:
        def _foot_b(tm_, tn_):
            return (2 * tm_ * in_features * cb   # x tile
                    + 2 * in_features * rank * cb   # W1^T (constant block)
                    + 2 * rank * tn_ * cb        # W2^T N tile
                    + 2 * tn_ * bb               # bias N tile
                    + 2 * tm_ * tn_ * ob         # output tile
                    + tm_ * rank * cb)           # hidden scratch (compute dtype)

        tn_cap = min(_round_up(tile_n, 128), out_p)
        divisors = [c for c in range(128, tn_cap + 1, 128) if out_p % c == 0]
        tn = divisors[0]
        for c in divisors:
            if _foot_b(tm, c) <= usable:
                tn = c                           # largest lane-aligned divisor that fits
        while _foot_b(tm, tn) > usable and tm > sub:
            tm = max(sub, _round_up(max(tm // 2, sub), sub))
        tk = in_features
        grid_k = 1
        footprint = _foot_b(tm, tn)

    # ---- padding / grid ---------------------------------------------------------------
    m_p = _round_up(m, tm)
    if m_p != m:
        x2d = jnp.pad(x2d, ((0, m_p - m), (0, 0)))
    grid_m = m_p // tm

    flops = 2 * m_p * in_features * rank + 2 * m_p * rank * out_p
    bytes_accessed = (m_p * in_features * cb + in_features * rank * cb
                      + rank * out_p * cb + out_p * bb + m_p * out_p * ob)
    cost = pl.CostEstimate(flops=flops, transcendentals=0,
                           bytes_accessed=bytes_accessed)
    vmem_limit = int(min(max(footprint * 3 // 2, 32 * 1024 * 1024), (cap * 9) // 10))

    if use_resident:
        grid = (grid_m, grid_k)
        kernel = functools.partial(_lora_kernel_resident, has_bias=has_bias)
        in_specs = [
            pl.BlockSpec((tm, tk), lambda i, k: (i, k)),
            pl.BlockSpec((tk, rank), lambda i, k: (k, 0)),
            pl.BlockSpec((rank, out_p), lambda i, k: (0, 0)),   # resident, DMA'd once
        ]
        args = [x2d, w1t, w2t]
        if has_bias:
            in_specs.append(pl.BlockSpec((1, out_p), lambda i, k: (0, 0)))
            args.append(b2d)
        out_spec = pl.BlockSpec((tm, out_p), lambda i, k: (i, 0))
        scratch = [pltpu.VMEM((tm, rank), jnp.float32)]          # f32 K accumulator
    else:
        grid = (grid_m, out_p // tn)
        kernel = functools.partial(_lora_kernel_tiled_n, has_bias=has_bias)
        in_specs = [
            pl.BlockSpec((tm, in_features), lambda i, j: (i, 0)),
            pl.BlockSpec((in_features, rank), lambda i, j: (0, 0)),
            pl.BlockSpec((rank, tn), lambda i, j: (0, j)),
        ]
        args = [x2d, w1t, w2t]
        if has_bias:
            in_specs.append(pl.BlockSpec((1, tn), lambda i, j: (0, j)))
            args.append(b2d)
        out_spec = pl.BlockSpec((tm, tn), lambda i, j: (i, j))
        scratch = [pltpu.VMEM((tm, rank), cdt)]                  # compute-dtype cache

    out2d = pl.pallas_call(
        kernel,
        out_shape=jax.ShapeDtypeStruct((m_p, out_p), odt),
        grid_spec=pltpu.PrefetchScalarGridSpec(
            num_scalar_prefetch=0,
            grid=grid,
            in_specs=in_specs,
            out_specs=out_spec,
            scratch_shapes=scratch,
        ),
        compiler_params=pltpu.CompilerParams(
            # M axis parallel (megacore).  The second axis must stay sequential
            # ("arbitrary"): it carries either the K accumulation (resident mode) or
            # the hidden-scratch reuse (tiled-N mode).
            dimension_semantics=("parallel", "arbitrary"),
            vmem_limit_bytes=vmem_limit,
        ),
        cost_estimate=cost,
    )(*args)

    out2d = out2d[:m, :out_features]
    return out2d.reshape(*lead_shape, out_features)


def lora_lin_forward(x, w1, w2, b=None, *, compute_dtype=None, tile_m=256,
                     tile_n=512, out_dtype=None, force_tiled_n=False, max_tk=None):
    """Convenience wrapper matching the PyTorch module's forward.

    NOTE: transposes/pads the weights on every call; for repeated use, call
    prepare_lora_lin_weights() once and reuse lora_lin_apply() with the result.
    """
    w1t, w2t, b2d, out_features = prepare_lora_lin_weights(
        w1, w2, b, compute_dtype=compute_dtype)
    return lora_lin_apply(x, w1t, w2t, b2d, out_features=out_features,
                          tile_m=tile_m, tile_n=tile_n, out_dtype=out_dtype,
                          force_tiled_n=force_tiled_n, max_tk=max_tk)


def init_lora_lin_params(key, in_features, out_features, rank_ratio=0.5,
                         dtype=jnp.float32):
    """Deterministic PyTorch-style init (kaiming-uniform bound = 1/sqrt(fan_in))."""
    rank = max(2, int(min(in_features, out_features) * rank_ratio))
    k1, k2, k3 = jax.random.split(key, 3)
    bound1 = 1.0 / (in_features ** 0.5)
    bound2 = 1.0 / (rank ** 0.5)
    w1 = jax.random.uniform(k1, (rank, in_features), dtype,
                            minval=-bound1, maxval=bound1)
    w2 = jax.random.uniform(k2, (out_features, rank), dtype,
                            minval=-bound2, maxval=bound2)
    b = jax.random.uniform(k3, (out_features,), dtype,
                           minval=-bound2, maxval=bound2)
    return w1, w2, b


if __name__ == "__main__":
    key = jax.random.PRNGKey(0)
    kx, kp, kp2 = jax.random.split(key, 3)

    # Small shapes consistent with the module: batch=2, seq=8, in=32, out=64.
    batch, seq, in_features, out_features = 2, 8, 32, 64
    w1, w2, b = init_lora_lin_params(kp, in_features, out_features, rank_ratio=0.5)
    x = jax.random.normal(kx, (batch, seq, in_features), jnp.float32)
    y_ref = (x @ w1.T) @ w2.T + b

    # f32, resident-W2 mode.
    y = jax.block_until_ready(lora_lin_forward(x, w1, w2, b))
    assert y.shape == (batch, seq, out_features)
    assert jnp.allclose(y, y_ref, atol=1e-4, rtol=1e-4)

    # No-bias variant (skips the bias stream and the broadcast-add entirely).
    y_nb = jax.block_until_ready(lora_lin_forward(x, w1, w2, None))
    assert jnp.allclose(y_nb, (x @ w1.T) @ w2.T, atol=1e-4, rtol=1e-4)

    # Ragged flattened batch (not tile-aligned) exercises the row-padding path.
    x_r = jax.random.normal(kx, (3, 5, in_features), jnp.float32)
    y_r = jax.block_until_ready(lora_lin_forward(x_r, w1, w2, b))
    assert jnp.allclose(y_r, (x_r @ w1.T) @ w2.T + b, atol=1e-4, rtol=1e-4)

    # Prepared (cached) weights + bf16 MXU-native operands, f32 accumulation.
    w1t, w2t, b2d, out_f = prepare_lora_lin_weights(w1, w2, b,
                                                    compute_dtype=jnp.bfloat16)
    y_bf = jax.block_until_ready(
        lora_lin_apply(x, w1t, w2t, b2d, out_features=out_f))
    assert jnp.allclose(y_bf, y_ref, atol=5e-2, rtol=5e-2)

    # Tiled-N fallback path (forced) with multiple N tiles.
    in2, out2 = 32, 256
    w1b, w2b, bb_ = init_lora_lin_params(kp2, in2, out2, rank_ratio=0.5)
    xb = jax.random.normal(kx, (batch, seq, in2), jnp.float32)
    yb_ref = (xb @ w1b.T) @ w2b.T + bb_
    yb = jax.block_until_ready(
        lora_lin_forward(xb, w1b, w2b, bb_, force_tiled_n=True, tile_n=128))
    assert jnp.allclose(yb, yb_ref, atol=1e-4, rtol=1e-4)

    # Resident mode with K-streamed W1^T (forced small K chunk -> grid_k = 2).
    in3, out3 = 256, 64
    w1c, w2c, bc = init_lora_lin_params(kp2, in3, out3, rank_ratio=0.5)
    xc = jax.random.normal(kx, (batch, seq, in3), jnp.float32)
    yc_ref = (xc @ w1c.T) @ w2c.T + bc
    yc = jax.block_until_ready(lora_lin_forward(xc, w1c, w2c, bc, max_tk=128))
    assert jnp.allclose(yc, yc_ref, atol=1e-4, rtol=1e-4)

    print("KERNEL_OK")
</pallas_src>

<mosaic_0001>
module attributes {stable_mosaic.version = 11 : i64} {
  func.func @_lora_kernel_resident(%arg0: i32, %arg1: i32, %arg2: memref<8x32xf32, #tpu.memory_space<vmem>>, %arg3: memref<32x16xf32, #tpu.memory_space<vmem>>, %arg4: memref<16x128xf32, #tpu.memory_space<vmem>>, %arg5: memref<1x128xf32, #tpu.memory_space<vmem>>, %arg6: memref<8x128xf32, #tpu.memory_space<vmem>>, %arg7: memref<8x16xf32, #tpu.memory_space<vmem>>) attributes {dimension_semantics = [#tpu.dimension_semantics<parallel>, #tpu.dimension_semantics<arbitrary>], iteration_bounds = array<i64: 2, 1>, scalar_prefetch = 0 : i64, scratch_operands = 1 : i64, tpu.core_type = #tpu.core_type<tc>, window_params = [{transform_indices = @transform_0, window_bounds = array<i64: 8, 32>}, {transform_indices = @transform_1, window_bounds = array<i64: 32, 16>}, {pipeline_mode = #tpu.pipeline_mode<synchronous>, transform_indices = @transform_2, window_bounds = array<i64: 16, 128>}, {pipeline_mode = #tpu.pipeline_mode<synchronous>, transform_indices = @transform_3, window_bounds = array<i64: 1, 128>}, {transform_indices = @transform_4, window_bounds = array<i64: 8, 128>}]} {
    %c0 = arith.constant 0 : index
    %c0_0 = arith.constant 0 : index
    %0 = vector.load %arg2[%c0, %c0_0] : memref<8x32xf32, #tpu.memory_space<vmem>>, vector<8x32xf32>
    %c0_1 = arith.constant 0 : index
    %c0_2 = arith.constant 0 : index
    %1 = vector.load %arg3[%c0_1, %c0_2] : memref<32x16xf32, #tpu.memory_space<vmem>>, vector<32x16xf32>
    %cst = arith.constant dense<0.000000e+00> : vector<8x16xf32>
    %2 = tpu.matmul %0, %1, %cst {dimension_numbers = #tpu.dot_dimension_numbers<[1], [0], [0], [1], [0, 0, 1, 1], [], []>} : vector<8x32xf32>, vector<32x16xf32>, vector<8x16xf32> -> vector<8x16xf32>
    %c0_i32 = arith.constant 0 : i32
    %3 = arith.cmpi eq, %arg1, %c0_i32 : i32
    %4 = arith.extui %3 : i1 to i32
    %c0_i32_3 = arith.constant 0 : i32
    %5 = arith.cmpi ne, %4, %c0_i32_3 : i32
    scf.if %5 {
      %c0_8 = arith.constant 0 : index
      %c0_9 = arith.constant 0 : index
      %12 = vector.load %arg7[%c0_8, %c0_9] : memref<8x16xf32, #tpu.memory_space<vmem>>, vector<8x16xf32>
      tpu.vector_store %arg7[%c0_8, %c0_9], %2 {strides = array<i32>} : memref<8x16xf32, #tpu.memory_space<vmem>>, vector<8x16xf32>,
    } else {
    }
    %c0_i32_4 = arith.constant 0 : i32
    %6 = arith.cmpi sgt, %arg1, %c0_i32_4 : i32
    %7 = arith.extui %6 : i1 to i32
    %c0_i32_5 = arith.constant 0 : i32
    %8 = arith.cmpi ne, %7, %c0_i32_5 : i32
    scf.if %8 {
      %c0_8 = arith.constant 0 : index
      %c0_9 = arith.constant 0 : index
      %12 = vector.load %arg7[%c0_8, %c0_9] : memref<8x16xf32, #tpu.memory_space<vmem>>, vector<8x16xf32>
      %13 = arith.addf %12, %2 : vector<8x16xf32>
      %c0_10 = arith.constant 0 : index
      %c0_11 = arith.constant 0 : index
      %14 = vector.load %arg7[%c0_10, %c0_11] : memref<8x16xf32, #tpu.memory_space<vmem>>, vector<8x16xf32>
      tpu.vector_store %arg7[%c0_10, %c0_11], %13 {strides = array<i32>} : memref<8x16xf32, #tpu.memory_space<vmem>>, vector<8x16xf32>,
    } else {
    }
    %c0_i32_6 = arith.constant 0 : i32
    %9 = arith.cmpi eq, %arg1, %c0_i32_6 : i32
    %10 = arith.extui %9 : i1 to i32
    %c0_i32_7 = arith.constant 0 : i32
    %11 = arith.cmpi ne, %10, %c0_i32_7 : i32
    scf.if %11 {
      %c0_8 = arith.constant 0 : index
      %c0_9 = arith.constant 0 : index
      %12 = vector.load %arg7[%c0_8, %c0_9] : memref<8x16xf32, #tpu.memory_space<vmem>>, vector<8x16xf32>
      %c0_10 = arith.constant 0 : index
      %c0_11 = arith.constant 0 : index
      %13 = vector.load %arg4[%c0_10, %c0_11] : memref<16x128xf32, #tpu.memory_space<vmem>>, vector<16x128xf32>
      %cst_12 = arith.constant dense<0.000000e+00> : vector<8x128xf32>
      %14 = tpu.matmul %12, %13, %cst_12 {dimension_numbers = #tpu.dot_dimension_numbers<[1], [0], [0], [1], [0, 0, 1, 1], [], []>} : vector<8x16xf32>, vector<16x128xf32>, vector<8x128xf32> -> vector<8x128xf32>
      %c0_13 = arith.constant 0 : index
      %c0_14 = arith.constant 0 : index
      %15 = vector.load %arg5[%c0_13, %c0_14] : memref<1x128xf32, #tpu.memory_space<vmem>>, vector<1x128xf32>
      %16 = vector.broadcast %15 : vector<1x128xf32> to vector<8x128xf32>
      %17 = arith.addf %14, %16 : vector<8x128xf32>
      %c0_15 = arith.constant 0 : index
      %c0_16 = arith.constant 0 : index
      %18 = vector.load %arg6[%c0_15, %c0_16] : memref<8x128xf32, #tpu.memory_space<vmem>>, vector<8x128xf32>
      tpu.vector_store %arg6[%c0_15, %c0_16], %17 {strides = array<i32>} : memref<8x128xf32, #tpu.memory_space<vmem>>, vector<8x128xf32>,
    } else {
    }
    return
  }
  func.func @transform_0(%arg0: i32, %arg1: i32) -> (i32, i32) {
    %c0_i32 = arith.constant 0 : i32
    return %arg0, %arg1 : i32, i32
  }
  func.func @transform_1(%arg0: i32, %arg1: i32) -> (i32, i32) {
    %c0_i32 = arith.constant 0 : i32
    %c0_i32_0 = arith.constant 0 : i32
    return %arg1, %c0_i32 : i32, i32
  }
  func.func @transform_2(%arg0: i32, %arg1: i32) -> (i32, i32) {
    %c0_i32 = arith.constant 0 : i32
    %c0_i32_0 = arith.constant 0 : i32
    %c0_i32_1 = arith.constant 0 : i32
    return %c0_i32, %c0_i32_0 : i32, i32
  }
  func.func @transform_3(%arg0: i32, %arg1: i32) -> (i32, i32) {
    %c0_i32 = arith.constant 0 : i32
    %c0_i32_0 = arith.constant 0 : i32
    %c0_i32_1 = arith.constant 0 : i32
    return %c0_i32, %c0_i32_0 : i32, i32
  }
  func.func @transform_4(%arg0: i32, %arg1: i32) -> (i32, i32) {
    %c0_i32 = arith.constant 0 : i32
    %c0_i32_0 = arith.constant 0 : i32
    return %arg0, %c0_i32 : i32, i32
  }
}

</mosaic_0001>

<bundles_post_ra>
// kernel: lora_lin_apply.1
= control target key start
LH: loop header
LB: loop body
LE: loop exit
PB: predicated region body
PF: predicated region fallthrough
CT: control target
= control target key end

     0   :  { %s615_s15 = smov 0   ;;  %s617_s16 = smov 0   ;;  %s672_s0 = inlined_call_operand.vmem [shape: f32[16,32], index: 0, kind: input, shape index: {}]   ;;  %s673_s1 = inlined_call_operand.vmem [shape: f32[32,16], index: 1, kind: input, shape index: {}]   ;;  %s674_s2 = inlined_call_operand.vmem [shape: f32[16,128], index: 2, kind: input, shape index: {}]   ;;  %s675_s3 = inlined_call_operand.vmem [shape: f32[1,128], index: 3, kind: input, shape index: {}]   ;;  %s676_s4 = inlined_call_operand.vmem [shape: f32[16,128], index: 4, kind: output, shape index: {}]  }
   0x1   :  { %s619_s17 = smov 0  }
   0x2 LB: > { %s26_s18 = sadd.s32 1, %s582_s16  ;;  %p504_p0 = scmp.ge.s32.totalorder %s586_s17, 1  ;;  %s586_s17 = sphi %s619_s17, %s14_s17   ;;  %s582_s16 = sphi %s617_s16, %s678_s16   ;;  %s578_s15 = sphi %s615_s15, %s677_s15  }
   0x3   : > { %p28_p1 = scmp.ge.s32.totalorder %s26_s18, 2  ;;  %p189_p2 = scmp.lt.s32.totalorder %s586_s17, 3 }
   0x5   : > { %s680_s18 = smov (%p28_p1, %s26_s18), 0  ;;  %p190_p3 = pnand %p504_p0, %p189_p2 }
   0x6   : > { %p221_p4 = scmp.lt.s32.totalorder (!%p190_p3), %s578_s15, 1 }
   0x7   : > { %193 = sbr.rel (%p190_p3) target bundleno = 418 (0x1a2), region = 36 }
   0xc   : > { %v242_v0 = vld [vmem:[%s673_s1 + $0x18] sm:$0xff]  ;;  %v588_v1 = vmov 0.0   ;;  %v241_v2 = vld [vmem:[%s673_s1 + $0x10] sm:$0xff]  ;;  %vm589_vm0 = vmmov 0   ;;  %s682_s15 = smov (!%p221_p4, %s578_s15), 1  ;;  %v240_v3 = vld [vmem:[%s673_s1 + $0x8] sm:$0xff] }
   0xd   : > { %520 = vmatprep.subr.mxu0 %v588_v1  ;;  %528 = vmatprep.mubr.msk.f32.mxu0 %vm589_vm0, %v588_v1  ;;  %s505_s25 = sshll.u32 %s682_s15, 3  ;;  %v239_v4 = vld [vmem:[%s673_s1] sm:$0xff]  ;;  %vm243_vm1 = vcmask 261120   ;;  %v336_v6 = vld [vmem:[%s674_s2 + $0x8] sm:$0xff]  ;;  %vm321_vm2 = vcmask 130048  }
   0xe   : > { %521 = vmatpush3.msra.mxu0 %v242_v0  ;;  %531 = vmatprep.subr.mxu1 %v588_v1  ;;  %s227_s30 = scalar_lea.vmem %s672_s0, %s505_s25  ;;  %v335_v7 = vld [vmem:[%s674_s2] sm:$0xff]  ;;  %s237_s13 = scalar_lea.vmem %s676_s4, %s505_s25 }
   0xf   : > { %522 = vmatprep.subr.mxu0 %v588_v1  ;;  %535 = vmatprep.mubr.msk.f32.mxu1 %vm589_vm0, %v588_v1  ;;  %v238_v5 = vld [vmem:[%s227_s30] sm:$0xff] }
  0x10   : > { %523 = vmatpush3.msra.mxu0 %v241_v2  ;;  %532 = vmatpush3.msra.mxu1 %v336_v6  ;;  %v508_v11 = vld [vmem:[%s675_s3] ss:$0 sm:$0xff] }
  0x11   : > { %524 = vmatprep.subr.mxu0 %v588_v1  ;;  %533 = vmatprep.subr.mxu1 %v588_v1 }
  0x12   : > { %525 = vmatpush3.msra.mxu0 %v240_v3  ;;  %534 = vmatpush3.msra.mxu1 %v335_v7 }
  0x13   : > { %526 = vmatprep.subr.mxu0 %v588_v1 }
  0x14   : > { %527 = vmatpush3.msra.mxu0 %v239_v4 }
  0x15   : > { %529 = vmatmul.mubr.msk.f32.vlgmr.msra.gmra.mxu0 %vm243_vm1, %v238_v5 }
  0xd5   : > { %v313_v8 = vpop.f32.mrf.mxu0 }
  0xd6   : > { %322 = vst.msk [vmem:[#allocation2] sm:$0xff] %vm321_vm2, %v313_v8 }
  0xd7   : > { %v530_v9 = vpop.f32.mrf.mxu0 }
  0xdd   : > { %v334_v10 = vld [vmem:[#allocation2] sm:$0xff] }
  0xde   : > { %536 = vmatmul.mubr.msk.f32.vlgmr.msra.gmra.mxu1 %vm321_vm2, %v334_v10 }
 0x19e   : > { %v414_v12 = vpop.f32.mrf.mxu1 }
 0x19f   : > { %v415_v13 = vadd.f32 %v508_v11, %v414_v12 }
 0x1a0   : > { %v537_v14 = vpop.f32.mrf.mxu1 }
 0x1a1   : > { %418 = vst [vmem:[%s237_s13] sm:$0xff] %v415_v13 }
 0x1a2 PF: > { %s14_s17 = sadd.s32 1, %s586_s17   ;;  %s677_s15 = smov %s582_s16 }
 0x1a3   : > { %p11_p5 = scmp.ge.s32.totalorder %s14_s17, 4   ;;  %s678_s16 = smov %s680_s18 }
 0x1a5   :  { %13 = sbr.rel (!%p11_p5) target bundleno = 2 (0x2), region = 81 }

</bundles_post_ra>
